<compile_context>
chip_gen: v7x
topology: tpu7x:2x2x1
jax: 0.10.0
libtpu: 0.0.40
codegen_flags: <defaults>
</compile_context>

<pallas_src>
import functools

import jax
import jax.numpy as jnp
from jax.experimental import pallas as pl
from jax.experimental.pallas import tpu as pltpu


# ---------------------------------------------------------------------------
# Static configuration (the nn.Module's __init__ argument).
# ---------------------------------------------------------------------------
ATT_DOMAINS = [("att_a", 2), ("att_b", 4), ("att_c", 2), ("att_d", 5)]
SIZE_AVERAGE = True

# Default batch rows per grid step.  Real HBM traffic per step at 16384 rows is
# ~1 MiB (good DMA/overhead ratio); the lane-padded double-buffered VMEM
# footprint is ~32 MiB, which we cover explicitly with vmem_limit_bytes and
# which fits all generations (v7x physical VMEM is 64 MiB).
_DEFAULT_BATCH_TILE = 16384


def domains_per_att(att_domains):
    return [1 if x[1] == 2 else x[1] for x in att_domains]


def input_size(att_domains):
    return sum(domains_per_att(att_domains))


# ---------------------------------------------------------------------------
# Pallas kernel.  Attribute layout (column offsets, domain sizes) is static
# Python config, so the per-attribute loop unrolls at trace time.
# Grid = (core_splits, blocks_per_split); the inner axis is the batch
# reduction ("arbitrary"), the outer axis is "parallel" (v7x 2-TC sharding).
# The output block (1, 1, num_atts) is resident across the inner axis and is
# used as the accumulator.
# ---------------------------------------------------------------------------
def _attribute_loss_kernel(x_ref, gt_ref, o_ref, *, d_per_att, batch, tb,
                           blocks_per_split, needs_mask):
    num_atts = len(d_per_att)
    s = pl.program_id(0)          # core split (parallel)
    i = pl.program_id(1)          # batch block within split (reduction)

    @pl.when(i == 0)
    def _init():
        o_ref[...] = jnp.zeros_like(o_ref)

    # Sublane mask for the ragged last block (only generated when needed).
    if needs_mask:
        row = jax.lax.broadcasted_iota(jnp.int32, (tb, 1), 0)        # (tb, 1)
        block_idx = s * blocks_per_split + i
        valid = (row + block_idx * tb) < batch                       # (tb, 1)
    else:
        valid = None

    # Hoist / dedup the one-hot iotas per distinct multiclass domain size
    # (JAX does not CSE broadcast_in_dim).
    iotas = {d: jax.lax.broadcasted_iota(jnp.int32, (tb, d), 1)
             for d in sorted(set(dd for dd in d_per_att if dd > 1))}
    out_lane = jax.lax.broadcasted_iota(jnp.int32, (1, num_atts), 1)

    step_sum = jnp.zeros((1, num_atts), jnp.float32)
    start = 0
    for a, d in enumerate(d_per_att):
        if d == 1:
            # Binary cross entropy with logits (numerically stable):
            #   max(x, 0) - x*y + log1p(exp(-|x|))
            logit = x_ref[:, start:start + 1].astype(jnp.float32)    # (tb, 1)
            y = gt_ref[:, a:a + 1].astype(jnp.float32)               # (tb, 1)
            per_ex = (jnp.maximum(logit, 0.0)
                      - logit * y
                      + jnp.log1p(jnp.exp(-jnp.abs(logit))))         # (tb, 1)
        else:
            # Softmax cross entropy: logsumexp(logits) - logits[label]
            logits = x_ref[:, start:start + d].astype(jnp.float32)   # (tb, d)
            m = jnp.max(logits, axis=1, keepdims=True)               # (tb, 1)
            lse = m + jnp.log(
                jnp.sum(jnp.exp(logits - m), axis=1, keepdims=True))  # (tb, 1)
            onehot = (iotas[d] ==
                      gt_ref[:, a:a + 1].astype(jnp.int32)).astype(jnp.float32)
            correct = jnp.sum(logits * onehot, axis=1, keepdims=True)  # (tb, 1)
            per_ex = lse - correct                                   # (tb, 1)

        if valid is not None:
            per_ex = jnp.where(valid, per_ex, 0.0)    # select, never multiply

        col = jnp.sum(per_ex, axis=0, keepdims=True)                 # (1, 1)
        # Place this attribute's partial sum in lane `a` of the step vector.
        step_sum = step_sum + jnp.where(out_lane == a, col, 0.0)     # (1, num_atts)
        start += d

    # Accumulate into the VMEM-resident output block (written back to HBM only
    # when the split index changes / at the end of the grid).
    o_ref[0] += step_sum


# ---------------------------------------------------------------------------
# Wrapper: no layout plumbing -- the native (B, total_cols)/(B, num_atts)
# arrays go straight into the pallas_call.
# ---------------------------------------------------------------------------
def attribute_loss(input_data, gt_atts, att_domains=ATT_DOMAINS,
                   size_average=SIZE_AVERAGE, batch_tile=_DEFAULT_BATCH_TILE,
                   core_splits=2):
    """input_data: (B, sum(domains_per_att)); gt_atts: (B, len(domains)) int."""
    d_per_att = domains_per_att(att_domains)
    total_cols = sum(d_per_att)
    if input_data.shape[1] != total_cols:
        raise ValueError(
            "Input is of wrong size {} vs (batch_size, {})".format(
                input_data.shape, total_cols))
    num_atts = len(d_per_att)
    batch = input_data.shape[0]

    # Sublane tile: multiple of the sublane packing granularity (8 for 4-byte,
    # 16 for 2-byte dtypes), or the full batch when the batch is tiny.
    sub = {4: 8, 2: 16, 1: 32}.get(jnp.dtype(input_data.dtype).itemsize, 8)
    if batch <= sub:
        tb = batch                       # single block == full array dims
    else:
        tb = min(int(batch_tile), batch)
        tb = max(sub, (tb // sub) * sub)
    n_blocks = pl.cdiv(batch, tb)
    needs_mask = (n_blocks * tb != batch)

    # Optional split of the reduction across a leading "parallel" grid axis
    # (v7x: 2 TensorCores).  Only used when it divides the block count evenly
    # so no fully out-of-bounds blocks ever occur.
    splits = core_splits if (core_splits > 1 and n_blocks % core_splits == 0) else 1
    bps = n_blocks // splits

    # Keep labels as-is when they are already an integer dtype (no extra HBM
    # pass); the kernel casts after the VMEM load.
    gt = gt_atts if jnp.issubdtype(gt_atts.dtype, jnp.integer) \
        else gt_atts.astype(jnp.int32)

    kernel = functools.partial(
        _attribute_loss_kernel,
        d_per_att=tuple(d_per_att), batch=batch, tb=tb,
        blocks_per_split=bps, needs_mask=needs_mask)

    # Double-buffered, lane-padded VMEM footprint of the two input streams
    # (upper-bounded at 4 B/elem) plus slack.
    lanes_x = pl.cdiv(total_cols, 128) * 128
    lanes_g = pl.cdiv(num_atts, 128) * 128
    vmem_limit = int(2 * tb * (lanes_x + lanes_g) * 4 + (4 << 20))

    partials = pl.pallas_call(
        kernel,
        out_shape=jax.ShapeDtypeStruct((splits, 1, num_atts), jnp.float32),
        grid_spec=pltpu.PrefetchScalarGridSpec(
            num_scalar_prefetch=0,
            grid=(splits, bps),
            in_specs=[
                pl.BlockSpec((tb, total_cols), lambda s, i: (s * bps + i, 0)),
                pl.BlockSpec((tb, num_atts), lambda s, i: (s * bps + i, 0)),
            ],
            out_specs=pl.BlockSpec((1, 1, num_atts), lambda s, i: (s, 0, 0)),
        ),
        compiler_params=pltpu.CompilerParams(
            dimension_semantics=("parallel", "arbitrary"),
            vmem_limit_bytes=vmem_limit),
    )(input_data, gt)

    total = jnp.sum(partials[:, 0, :], axis=0)          # (num_atts,)
    if size_average:
        total = total * (1.0 / float(batch))
    return total


# ---------------------------------------------------------------------------
# Pure-JAX reference for correctness checks.
# ---------------------------------------------------------------------------
def attribute_loss_ref(input_data, gt_atts, att_domains=ATT_DOMAINS,
                       size_average=SIZE_AVERAGE):
    d_per_att = domains_per_att(att_domains)
    x = input_data.astype(jnp.float32)
    losses = []
    start = 0
    for a, d in enumerate(d_per_att):
        if d == 1:
            lg = x[:, start]
            y = gt_atts[:, a].astype(jnp.float32)
            per = (jnp.maximum(lg, 0.0) - lg * y
                   + jnp.log1p(jnp.exp(-jnp.abs(lg))))
        else:
            logits = x[:, start:start + d]
            lse = jax.scipy.special.logsumexp(logits, axis=1)
            correct = jnp.take_along_axis(
                logits, gt_atts[:, a:a + 1].astype(jnp.int32), axis=1)[:, 0]
            per = lse - correct
        losses.append(jnp.mean(per) if size_average else jnp.sum(per))
        start += d
    return jnp.stack(losses)


def _make_inputs(key, batch, d_per_att):
    total_cols = sum(d_per_att)
    num_atts = len(d_per_att)
    k_x, k_g = jax.random.split(key)
    x = jax.random.normal(k_x, (batch, total_cols), dtype=jnp.float32)
    gt_cols = []
    gkeys = jax.random.split(k_g, num_atts)
    for a, d in enumerate(d_per_att):
        hi = 2 if d == 1 else d
        gt_cols.append(jax.random.randint(gkeys[a], (batch,), 0, hi,
                                          dtype=jnp.int32))
    gt = jnp.stack(gt_cols, axis=1)
    return x, gt


if __name__ == "__main__":
    key = jax.random.PRNGKey(0)
    d_per_att = domains_per_att(ATT_DOMAINS)          # [1, 4, 1, 5]
    num_atts = len(ATT_DOMAINS)                       # 4

    # Case 1: small batch, single full block (no mask path), default tile.
    x1, gt1 = _make_inputs(key, 8, d_per_att)
    out1 = jax.block_until_ready(attribute_loss(x1, gt1))
    ref1 = attribute_loss_ref(x1, gt1)
    assert out1.shape == (num_atts,)
    assert jnp.allclose(out1, ref1, atol=1e-5, rtol=1e-5), (out1, ref1)

    # Case 1b: sum reduction (size_average=False).
    out1b = jax.block_until_ready(attribute_loss(x1, gt1, size_average=False))
    ref1b = attribute_loss_ref(x1, gt1, size_average=False)
    assert jnp.allclose(out1b, ref1b, atol=1e-4, rtol=1e-5), (out1b, ref1b)

    # Case 2: two blocks -> 2-way core split path + ragged last block mask
    # (batch=200, tile=128 -> n_blocks=2, splits=2).
    x2, gt2 = _make_inputs(jax.random.PRNGKey(1), 200, d_per_att)
    out2 = jax.block_until_ready(attribute_loss(x2, gt2, batch_tile=128))
    ref2 = attribute_loss_ref(x2, gt2)
    assert out2.shape == (num_atts,)
    assert jnp.allclose(out2, ref2, atol=1e-5, rtol=1e-5), (out2, ref2)

    # Case 3: odd block count -> single split, multi-step accumulation + mask
    # (batch=300, tile=64 -> 5 blocks).
    x3, gt3 = _make_inputs(jax.random.PRNGKey(2), 300, d_per_att)
    out3 = jax.block_until_ready(attribute_loss(x3, gt3, batch_tile=64))
    ref3 = attribute_loss_ref(x3, gt3)
    assert jnp.allclose(out3, ref3, atol=1e-5, rtol=1e-5), (out3, ref3)

    # Case 4: default (large) tile with batch that is not a multiple of 128
    # but is a multiple of 8 -> single block covering the whole batch.
    out4 = jax.block_until_ready(attribute_loss(x2, gt2))
    assert jnp.allclose(out4, ref2, atol=1e-5, rtol=1e-5), (out4, ref2)

    print("KERNEL_OK")
</pallas_src>

<mosaic_0001>
module attributes {stable_mosaic.version = 11 : i64} {
  func.func @_attribute_loss_kernel(%arg0: i32, %arg1: i32, %arg2: memref<8x11xf32, #tpu.memory_space<vmem>>, %arg3: memref<8x4xi32, #tpu.memory_space<vmem>>, %arg4: memref<1x1x4xf32, #tpu.memory_space<vmem>>) attributes {dimension_semantics = [#tpu.dimension_semantics<parallel>, #tpu.dimension_semantics<arbitrary>], iteration_bounds = array<i64: 1, 1>, scalar_prefetch = 0 : i64, scratch_operands = 0 : i64, tpu.core_type = #tpu.core_type<tc>, window_params = [{transform_indices = @transform_0, window_bounds = array<i64: 8, 11>}, {transform_indices = @transform_1, window_bounds = array<i64: 8, 4>}, {transform_indices = @transform_2, window_bounds = array<i64: 1, 1, 4>}]} {
    %c0_i32 = arith.constant 0 : i32
    %0 = arith.cmpi eq, %arg1, %c0_i32 : i32
    %1 = arith.extui %0 : i1 to i32
    %c0_i32_0 = arith.constant 0 : i32
    %2 = arith.cmpi ne, %1, %c0_i32_0 : i32
    scf.if %2 {
      %cst_36 = arith.constant 0.000000e+00 : f32
      %113 = vector.broadcast %cst_36 : f32 to vector<1x1x4xf32>
      %c0_37 = arith.constant 0 : index
      %c0_38 = arith.constant 0 : index
      %c0_39 = arith.constant 0 : index
      %114 = vector.load %arg4[%c0_37, %c0_38, %c0_39] : memref<1x1x4xf32, #tpu.memory_space<vmem>>, vector<1x1x4xf32>
      tpu.vector_store %arg4[%c0_37, %c0_38, %c0_39], %113 {strides = array<i32>} : memref<1x1x4xf32, #tpu.memory_space<vmem>>, vector<1x1x4xf32>,
    } else {
    }
    %3 = tpu.iota {dimensions = array<i32: 1>} : vector<8x4xi32>
    %4 = tpu.iota {dimensions = array<i32: 1>} : vector<8x5xi32>
    %5 = tpu.iota {dimensions = array<i32: 1>} : vector<1x4xi32>
    %cst = arith.constant 0.000000e+00 : f32
    %6 = vector.broadcast %cst : f32 to vector<1x4xf32>
    %c0 = arith.constant 0 : index
    %c0_1 = arith.constant 0 : index
    %7 = vector.load %arg2[%c0, %c0_1] : memref<8x11xf32, #tpu.memory_space<vmem>>, vector<8x1xf32>
    %c0_2 = arith.constant 0 : index
    %c0_3 = arith.constant 0 : index
    %8 = vector.load %arg3[%c0_2, %c0_3] : memref<8x4xi32, #tpu.memory_space<vmem>>, vector<8x1xi32>
    %9 = arith.sitofp %8 : vector<8x1xi32> to vector<8x1xf32>
    %cst_4 = arith.constant 0.000000e+00 : f32
    %10 = vector.broadcast %cst_4 : f32 to vector<8x1xf32>
    %11 = arith.maximumf %7, %10 : vector<8x1xf32>
    %12 = arith.mulf %7, %9 : vector<8x1xf32>
    %13 = arith.subf %11, %12 : vector<8x1xf32>
    %14 = math.absf %7 : vector<8x1xf32>
    %cst_5 = arith.constant 0.000000e+00 : f32
    %15 = vector.broadcast %cst_5 : f32 to vector<8x1xf32>
    %16 = arith.subf %15, %14 : vector<8x1xf32>
    %17 = math.exp %16 : vector<8x1xf32>
    %18 = math.log1p %17 : vector<8x1xf32>
    %19 = arith.addf %13, %18 : vector<8x1xf32>
    %cst_6 = arith.constant dense<0.000000e+00> : vector<1xf32>
    %20 = vector.multi_reduction <add>, %19, %cst_6 [0] : vector<8x1xf32> to vector<1xf32>
    %21 = vector.shape_cast %20 : vector<1xf32> to vector<1x1xf32>
    %c0_i32_7 = arith.constant 0 : i32
    %22 = vector.broadcast %c0_i32_7 : i32 to vector<1x4xi32>
    %23 = arith.cmpi eq, %5, %22 : vector<1x4xi32>
    %cst_8 = arith.constant 0.000000e+00 : f32
    %24 = vector.shape_cast %21 : vector<1x1xf32> to vector<1x1xf32>
    %25 = vector.broadcast %24 : vector<1x1xf32> to vector<1x4xf32>
    %26 = vector.broadcast %cst_8 : f32 to vector<1x4xf32>
    %27 = arith.select %23, %25, %26 : vector<1x4xi1>, vector<1x4xf32>
    %28 = arith.addf %6, %27 : vector<1x4xf32>
    %c0_9 = arith.constant 0 : index
    %c1 = arith.constant 1 : index
    %29 = vector.load %arg2[%c0_9, %c1] : memref<8x11xf32, #tpu.memory_space<vmem>>, vector<8x4xf32>
    %cst_10 = arith.constant dense<0xFF800000> : vector<8xf32>
    %30 = vector.multi_reduction <maximumf>, %29, %cst_10 [1] : vector<8x4xf32> to vector<8xf32>
    %31 = vector.shape_cast %30 : vector<8xf32> to vector<8x1xf32>
    %32 = vector.broadcast %31 : vector<8x1xf32> to vector<8x4xf32>
    %33 = arith.subf %29, %32 : vector<8x4xf32>
    %34 = math.exp %33 : vector<8x4xf32>
    %cst_11 = arith.constant dense<0.000000e+00> : vector<8xf32>
    %35 = vector.multi_reduction <add>, %34, %cst_11 [1] : vector<8x4xf32> to vector<8xf32>
    %36 = vector.shape_cast %35 : vector<8xf32> to vector<8x1xf32>
    %37 = math.log %36 : vector<8x1xf32>
    %38 = arith.addf %31, %37 : vector<8x1xf32>
    %c0_12 = arith.constant 0 : index
    %c1_13 = arith.constant 1 : index
    %39 = vector.load %arg3[%c0_12, %c1_13] : memref<8x4xi32, #tpu.memory_space<vmem>>, vector<8x1xi32>
    %40 = vector.broadcast %39 : vector<8x1xi32> to vector<8x4xi32>
    %41 = arith.cmpi eq, %3, %40 : vector<8x4xi32>
    %42 = arith.extui %41 : vector<8x4xi1> to vector<8x4xi32>
    %43 = arith.sitofp %42 : vector<8x4xi32> to vector<8x4xf32>
    %44 = arith.mulf %29, %43 : vector<8x4xf32>
    %cst_14 = arith.constant dense<0.000000e+00> : vector<8xf32>
    %45 = vector.multi_reduction <add>, %44, %cst_14 [1] : vector<8x4xf32> to vector<8xf32>
    %46 = vector.shape_cast %45 : vector<8xf32> to vector<8x1xf32>
    %47 = arith.subf %38, %46 : vector<8x1xf32>
    %cst_15 = arith.constant dense<0.000000e+00> : vector<1xf32>
    %48 = vector.multi_reduction <add>, %47, %cst_15 [0] : vector<8x1xf32> to vector<1xf32>
    %49 = vector.shape_cast %48 : vector<1xf32> to vector<1x1xf32>
    %c1_i32 = arith.constant 1 : i32
    %50 = vector.broadcast %c1_i32 : i32 to vector<1x4xi32>
    %51 = arith.cmpi eq, %5, %50 : vector<1x4xi32>
    %cst_16 = arith.constant 0.000000e+00 : f32
    %52 = vector.shape_cast %49 : vector<1x1xf32> to vector<1x1xf32>
    %53 = vector.broadcast %52 : vector<1x1xf32> to vector<1x4xf32>
    %54 = vector.broadcast %cst_16 : f32 to vector<1x4xf32>
    %55 = arith.select %51, %53, %54 : vector<1x4xi1>, vector<1x4xf32>
    %56 = arith.addf %28, %55 : vector<1x4xf32>
    %c0_17 = arith.constant 0 : index
    %c5 = arith.constant 5 : index
    %57 = vector.load %arg2[%c0_17, %c5] : memref<8x11xf32, #tpu.memory_space<vmem>>, vector<8x1xf32>
    %c0_18 = arith.constant 0 : index
    %c2 = arith.constant 2 : index
    %58 = vector.load %arg3[%c0_18, %c2] : memref<8x4xi32, #tpu.memory_space<vmem>>, vector<8x1xi32>
    %59 = arith.sitofp %58 : vector<8x1xi32> to vector<8x1xf32>
    %cst_19 = arith.constant 0.000000e+00 : f32
    %60 = vector.broadcast %cst_19 : f32 to vector<8x1xf32>
    %61 = arith.maximumf %57, %60 : vector<8x1xf32>
    %62 = arith.mulf %57, %59 : vector<8x1xf32>
    %63 = arith.subf %61, %62 : vector<8x1xf32>
    %64 = math.absf %57 : vector<8x1xf32>
    %cst_20 = arith.constant 0.000000e+00 : f32
    %65 = vector.broadcast %cst_20 : f32 to vector<8x1xf32>
    %66 = arith.subf %65, %64 : vector<8x1xf32>
    %67 = math.exp %66 : vector<8x1xf32>
    %68 = math.log1p %67 : vector<8x1xf32>
    %69 = arith.addf %63, %68 : vector<8x1xf32>
    %cst_21 = arith.constant dense<0.000000e+00> : vector<1xf32>
    %70 = vector.multi_reduction <add>, %69, %cst_21 [0] : vector<8x1xf32> to vector<1xf32>
    %71 = vector.shape_cast %70 : vector<1xf32> to vector<1x1xf32>
    %c2_i32 = arith.constant 2 : i32
    %72 = vector.broadcast %c2_i32 : i32 to vector<1x4xi32>
    %73 = arith.cmpi eq, %5, %72 : vector<1x4xi32>
    %cst_22 = arith.constant 0.000000e+00 : f32
    %74 = vector.shape_cast %71 : vector<1x1xf32> to vector<1x1xf32>
    %75 = vector.broadcast %74 : vector<1x1xf32> to vector<1x4xf32>
    %76 = vector.broadcast %cst_22 : f32 to vector<1x4xf32>
    %77 = arith.select %73, %75, %76 : vector<1x4xi1>, vector<1x4xf32>
    %78 = arith.addf %56, %77 : vector<1x4xf32>
    %c0_23 = arith.constant 0 : index
    %c6 = arith.constant 6 : index
    %79 = vector.load %arg2[%c0_23, %c6] : memref<8x11xf32, #tpu.memory_space<vmem>>, vector<8x5xf32>
    %cst_24 = arith.constant dense<0xFF800000> : vector<8xf32>
    %80 = vector.multi_reduction <maximumf>, %79, %cst_24 [1] : vector<8x5xf32> to vector<8xf32>
    %81 = vector.shape_cast %80 : vector<8xf32> to vector<8x1xf32>
    %82 = vector.broadcast %81 : vector<8x1xf32> to vector<8x5xf32>
    %83 = arith.subf %79, %82 : vector<8x5xf32>
    %84 = math.exp %83 : vector<8x5xf32>
    %cst_25 = arith.constant dense<0.000000e+00> : vector<8xf32>
    %85 = vector.multi_reduction <add>, %84, %cst_25 [1] : vector<8x5xf32> to vector<8xf32>
    %86 = vector.shape_cast %85 : vector<8xf32> to vector<8x1xf32>
    %87 = math.log %86 : vector<8x1xf32>
    %88 = arith.addf %81, %87 : vector<8x1xf32>
    %c0_26 = arith.constant 0 : index
    %c3 = arith.constant 3 : index
    %89 = vector.load %arg3[%c0_26, %c3] : memref<8x4xi32, #tpu.memory_space<vmem>>, vector<8x1xi32>
    %90 = vector.broadcast %89 : vector<8x1xi32> to vector<8x5xi32>
    %91 = arith.cmpi eq, %4, %90 : vector<8x5xi32>
    %92 = arith.extui %91 : vector<8x5xi1> to vector<8x5xi32>
    %93 = arith.sitofp %92 : vector<8x5xi32> to vector<8x5xf32>
    %94 = arith.mulf %79, %93 : vector<8x5xf32>
    %cst_27 = arith.constant dense<0.000000e+00> : vector<8xf32>
    %95 = vector.multi_reduction <add>, %94, %cst_27 [1] : vector<8x5xf32> to vector<8xf32>
    %96 = vector.shape_cast %95 : vector<8xf32> to vector<8x1xf32>
    %97 = arith.subf %88, %96 : vector<8x1xf32>
    %cst_28 = arith.constant dense<0.000000e+00> : vector<1xf32>
    %98 = vector.multi_reduction <add>, %97, %cst_28 [0] : vector<8x1xf32> to vector<1xf32>
    %99 = vector.shape_cast %98 : vector<1xf32> to vector<1x1xf32>
    %c3_i32 = arith.constant 3 : i32
    %100 = vector.broadcast %c3_i32 : i32 to vector<1x4xi32>
    %101 = arith.cmpi eq, %5, %100 : vector<1x4xi32>
    %cst_29 = arith.constant 0.000000e+00 : f32
    %102 = vector.shape_cast %99 : vector<1x1xf32> to vector<1x1xf32>
    %103 = vector.broadcast %102 : vector<1x1xf32> to vector<1x4xf32>
    %104 = vector.broadcast %cst_29 : f32 to vector<1x4xf32>
    %105 = arith.select %101, %103, %104 : vector<1x4xi1>, vector<1x4xf32>
    %106 = arith.addf %78, %105 : vector<1x4xf32>
    %c0_30 = arith.constant 0 : index
    %c0_31 = arith.constant 0 : index
    %c0_32 = arith.constant 0 : index
    %107 = vector.load %arg4[%c0_30, %c0_31, %c0_32] : memref<1x1x4xf32, #tpu.memory_space<vmem>>, vector<1x1x4xf32>
    %108 = vector.shape_cast %107 : vector<1x1x4xf32> to vector<1x4xf32>
    %109 = arith.addf %108, %106 : vector<1x4xf32>
    %c0_33 = arith.constant 0 : index
    %c0_34 = arith.constant 0 : index
    %c0_35 = arith.constant 0 : index
    %110 = vector.load %arg4[%c0_33, %c0_34, %c0_35] : memref<1x1x4xf32, #tpu.memory_space<vmem>>, vector<1x1x4xf32>
    %111 = vector.shape_cast %110 : vector<1x1x4xf32> to vector<1x4xf32>
    %112 = vector.shape_cast %109 : vector<1x4xf32> to vector<1x1x4xf32>
    tpu.vector_store %arg4[%c0_33, %c0_34, %c0_35], %112 {strides = array<i32>} : memref<1x1x4xf32, #tpu.memory_space<vmem>>, vector<1x1x4xf32>,
    return
  }
  func.func @transform_0(%arg0: i32, %arg1: i32) -> (i32, i32) {
    %c1_i32 = arith.constant 1 : i32
    %0 = arith.muli %arg0, %c1_i32 : i32
    %1 = arith.addi %0, %arg1 : i32
    %c0_i32 = arith.constant 0 : i32
    %c0_i32_0 = arith.constant 0 : i32
    return %1, %c0_i32 : i32, i32
  }
  func.func @transform_1(%arg0: i32, %arg1: i32) -> (i32, i32) {
    %c1_i32 = arith.constant 1 : i32
    %0 = arith.muli %arg0, %c1_i32 : i32
    %1 = arith.addi %0, %arg1 : i32
    %c0_i32 = arith.constant 0 : i32
    %c0_i32_0 = arith.constant 0 : i32
    return %1, %c0_i32 : i32, i32
  }
  func.func @transform_2(%arg0: i32, %arg1: i32) -> (i32, i32, i32) {
    %c0_i32 = arith.constant 0 : i32
    %c0_i32_0 = arith.constant 0 : i32
    %c0_i32_1 = arith.constant 0 : i32
    return %arg0, %c0_i32, %c0_i32_0 : i32, i32, i32
  }
}

</mosaic_0001>

<bundles_post_ra>
// kernel: tpu_custom_call.1
= control target key start
LH: loop header
LB: loop body
LE: loop exit
PB: predicated region body
PF: predicated region fallthrough
CT: control target
= control target key end

     0   :  { %vm90_vm0 = vcmask 39944   ;;  %vm159_vm1 = vcmask 89136   ;;  %v289_v2 = vmov 1   ;;  %vm50_vm2 = vcmask 24576   ;;  %s374_s0 = inlined_call_operand.vmem [shape: f32[8,11], index: 0, kind: input, shape index: {}]   ;;  %s375_s1 = inlined_call_operand.vmem [shape: s32[8,4], index: 1, kind: input, shape index: {}]   ;;  %s376_s2 = inlined_call_operand.hbm [shape: f32[1,1,4], index: 2, kind: output, shape index: {}]  }
   0x1   :  { %v318_v0 = vld [vmem:[%s375_s1] sm:$0xff]  ;;  %248 = vset.pattern.permute.xlu0 %v289_v2 }
   0x2   :  { %v323_v1 = vld [vmem:[%s374_s0] sm:$0xff]  ;;  %109 = vperm.xlu0 %248, %v318_v0  }
   0x3   :  { %v91_v3 = vsel %vm90_vm0, %v323_v1, -inf }
   0x4   :  { %92 = vmax.xlane.f32.xlu1 %v91_v3 }
   0x5   :  { %7 = vsyncpa [#allocation3], 0  ;;  %v160_v4 = vsel %vm159_vm1, %v323_v1, -inf  ;;  %v290_v5 = vmov 0.0   ;;  %v291_v6 = vmov 3   ;;  %v52_v7 = vlaneseq  ;;  %s293_s0 = smov 1  }
   0x6   :  { %51 = vst.msk [vmem:[#allocation2] sm:$0x1] %vm50_vm2, %v290_v5  ;;  %249 = vset.pattern.permute.xlu0 %v291_v6  ;;  %v292_v9 = vmov 0   ;;  %s294_s1 = smov 6   ;;  %s295_s13 = smov 127   ;;  %v56_v28 = vcvt.s32.f32 %v318_v0  ;;  %v57_v32 = vmax.f32 %v323_v1, 0.0 }
   0x7   :  { %178 = vperm.xlu0 %249, %v318_v0   ;;  %v331_v8 = vand.u32 127, %v52_v7  ;;  %250 = vset.pattern.permute.xlu1 %v292_v9  ;;  %s296_s14 = smov 122   ;;  %v60_v22 = vand.u32 2147483647, %v323_v1  ;;  %vm74_vm6 = vcmask 7168   ;;  %v297_v47 = vmov 5  }
   0x8   :  { %161 = vmax.xlane.f32.xlu1 %v160_v4  ;;  %v58_v33 = vmul.f32 %v56_v28, %v323_v1  ;;  %s298_s15 = smov 3   ;;  %vm101_vm7 = vcmask 31744   ;;  %vm170_vm8 = vcmask 39936   ;;  %vm143_vm9 = vcmask 48168   ;;  %s299_s16 = smov [#allocation2]  }
   0x9   :  { %v61_v23 = vsub.f32 0.0, %v60_v22  ;;  %vm82_vm10 = vcmp.eq.s32.totalorder %v331_v8, 0  ;;  %vm133_vm11 = vcmp.eq.s32.totalorder %v331_v8, 1  ;;  %vm151_vm12 = vcmp.eq.s32.totalorder %v331_v8, 2  ;;  %s215_s17 = sshll.u32 %s299_s16, 4  ;;  %s216_s17 = int_to_ptr.vmem [resolvable:$true] %s215_s17 }
   0xa   :  { %v59_v36 = vsub.f32 %v57_v32, %v58_v33  ;;  %vm202_vm13 = vcmp.eq.s32.totalorder %v331_v8, 3  ;;  %s265_s18 = scalar_lea.vmem %s216_s17, 16  ;;  %s269_s19 = scalar_lea.vmem %s216_s17, 32 }
   0xb   :  { %v62_v24 = vmul.f32 1.442695, %v61_v23  ;;  %251 = vset.pattern.permute.xlu0 %v297_v47  ;;  %p266_p0 = scmp.ne.s32.totalorder %s216_s17, %s265_s18  ;;  %p270_p1 = scmp.lt.s32.totalorder %s216_s17, %s216_s17 }
   0xc   :  { %p271_p2 = scmp.lt.s32.totalorder %s269_s19, %s265_s18 }
   0xe   :  { %p272_p3 = por %p271_p2, %p270_p1 }
  0x10   :  { %p273_p4 = pnand %p272_p3, %p266_p0 }
  0x81   :  { %v110_v10 = vpop.permute.xlu0 %109 }
  0x82   :  { %vm111_vm3 = vcmp.eq.s32.totalorder %v331_v8, %v110_v10 }
  0x83   :  { %v235_v11 = vsel %vm111_vm3, 1.0, %v290_v5 }
  0x84   :  { %115 = vrot.lane.b32.xlu1 %v235_v11, %s293_s0 }
  0x86   :  { %v179_v12 = vpop.permute.xlu0 %178 }
  0x87   :  { %vm180_vm4 = vcmp.eq.s32.totalorder %v331_v8, %v179_v12 }
  0x88   :  { %v236_v13 = vsel %vm180_vm4, 1.0, %v290_v5 }
  0x89   :  { %184 = vrot.lane.b32.xlu0 %v236_v13, %s294_s1 }
  0x91   :  { %v335_v14 = vpop.xlane.xlu1 %92 }
  0x92   :  { %v94_v15 = vsub.f32 %v323_v1, %v335_v14 }
  0x94   :  { %v95_v16 = vmul.f32 1.442695, %v94_v15 }
  0x95   :  { %v339_v17 = vpop.xlane.xlu1 %161 }
  0x96   :  { %253 = vpow2.f32 %v95_v16  ;;  %v163_v18 = vsub.f32 %v323_v1, %v339_v17 }
  0x98   :  { %v164_v19 = vmul.f32 1.442695, %v163_v18 }
  0x9a   :  { %255 = vpow2.f32 %v164_v19 }
  0x9b   :  { %257 = vpow2.f32 %v62_v24 }
  0xa0   :  { %v254_v20 = vpop.eup %253 }
  0xa1   :  { %98 = vrot.lane.b32.xlu0 %v254_v20, %s295_s13 }
  0xa4   :  { %v256_v21 = vpop.eup %255 }
  0xa5   :  { %167 = vrot.lane.b32.xlu0 %v256_v21, %s296_s14  ;;  %v258_v25 = vpop.eup %257 }
  0xa6   :  { %v64_v26 = vadd.f32 1.0, %v258_v25  ;;  %v67_v27 = vmul.f32 -0.5, %v258_v25  ;;  %v70_v31 = vand.u32 2147483647, %v258_v25 }
  0xa8   :  { %259 = vlog2.f32 %v64_v26  ;;  %v68_v29 = vadd.f32 1.0, %v67_v27  ;;  %vm71_vm5 = vcmp.lt.f32.partialorder %v70_v31, 0.0004427343 }
  0xaa   :  { %v69_v35 = vmul.f32 %v258_v25, %v68_v29 }
  0xb2   :  { %v260_v30 = vpop.eup %259 }
  0xb3   :  { %v66_v34 = vmul.f32 0.6931472, %v260_v30 }
  0xb5   :  { %v72_v37 = vsel %vm71_vm5, %v69_v35, %v66_v34 }
  0xb6   :  { %v73_v38 = vadd.f32 %v72_v37, %v59_v36 }
  0xb8   :  { %v75_v39 = vsel %vm74_vm6, %v73_v38, 0.0 }
  0xb9   :  { %v76_v40 = vrot.slane %v75_v39, 4 }
  0xbb   :  { %v77_v41 = vadd.f32 %v76_v40, %v75_v39  ;;  %v205_v39 = vld [vmem:[#allocation2] sm:$0x1] }
  0xbd   :  { %v78_v42 = vrot.slane %v77_v41, 2 }
  0xbf   :  { %v79_v44 = vadd.f32 %v78_v42, %v77_v41 }
  0xc1   :  { %v80_v46 = vrot.slane %v79_v44, 1 }
  0xc3   :  { %v81_v50 = vadd.f32 %v80_v46, %v79_v44 }
  0xf6   :  { %v116_v43 = vpop.permute.xlu1 %115 }
  0xf7   :  { %v118_v45 = vmul.f32 %v116_v43, %v323_v1 }
  0xf9   :  { %120 = vrot.lane.b32.xlu0 %v118_v45, %s295_s13 }
  0xfb   :  { %v185_v48 = vpop.permute.xlu0 %184 }
  0xfc   :  { %v187_v49 = vmul.f32 %v185_v48, %v323_v1 }
  0xfd   :  { %137 = vrot.lane.b32.xlu0 %v56_v28, %s298_s15 }
  0xfe   :  { %189 = vrot.lane.b32.xlu1 %v187_v49, %s296_s14 }
 0x102   :  { %85 = vperm.xlu1 %250, %v81_v50  }
 0x113   :  { %v99_v51 = vpop.permute.xlu0 %98 }
 0x114   :  { %v102_v52 = vsel %vm101_vm7, %v99_v51, 0.0 }
 0x117   :  { %v168_v53 = vpop.permute.xlu0 %167 }
 0x118   :  { %v171_v54 = vsel %vm170_vm8, %v168_v53, 0.0 }
 0x11c   :  { %103 = vadd.xlane.f32.xlu0 %v102_v52 }
 0x126   :  { %172 = vadd.xlane.f32.xlu1 %v171_v54 }
 0x16b   :  { %v121_v55 = vpop.permute.xlu0 %120 }
 0x16c   :  { %v123_v56 = vsel %vm101_vm7, %v121_v55, 0.0 }
 0x16d   :  { %124 = vadd.xlane.f32.xlu1 %v123_v56 }
 0x16f   :  { %v138_v57 = vpop.permute.xlu0 %137 }
 0x170   :  { %v190_v58 = vpop.permute.xlu1 %189  ;;  %v140_v59 = vmul.f32 %v138_v57, %v323_v1 }
 0x171   :  { %v192_v60 = vsel %vm170_vm8, %v190_v58, 0.0 }
 0x172   :  { %v141_v61 = vsub.f32 %v57_v32, %v140_v59  ;;  %193 = vadd.xlane.f32.xlu1 %v192_v60 }
 0x174   :  { %v142_v62 = vadd.f32 %v141_v61, %v72_v37 }
 0x176   :  { %v144_v63 = vsel %vm143_vm9, %v142_v62, 0.0 }
 0x177   :  { %v145_v0 = vrot.slane %v144_v63, 4 }
 0x179   :  { %v146_v2 = vadd.f32 %v145_v0, %v144_v63 }
 0x17b   :  { %v147_v3 = vrot.slane %v146_v2, 2 }
 0x17d   :  { %v148_v4 = vadd.f32 %v147_v3, %v146_v2 }
 0x17f   :  { %v149_v5 = vrot.slane %v148_v4, 1 }
 0x181   :  { %v150_v7 = vadd.f32 %v149_v5, %v148_v4  ;;  %v86_v9 = vpop.permute.xlu1 %85 }
 0x182   :  { %v88_v32 = vsel %vm82_vm10, %v86_v9, 0.0 }
 0x183   :  { %154 = vperm.xlu0 %251, %v150_v7  }
 0x187   :  { %252 = vset.pattern.permute.xlu0 %v291_v6 }
 0x1a9   :  { %v104_v10 = vpop.xlane.xlu0 %103 }
 0x1aa   :  { %261 = vlog2.f32 %v104_v10 }
 0x1b3   :  { %v173_v11 = vpop.xlane.xlu1 %172 }
 0x1b4   :  { %263 = vlog2.f32 %v173_v11  ;;  %v262_v1 = vpop.eup %261 }
 0x1b5   :  { %v106_v12 = vmul.f32 0.6931472, %v262_v1 }
 0x1b7   :  { %v107_v15 = vadd.f32 %v106_v12, %v335_v14 }
 0x1be   :  { %v264_v13 = vpop.eup %263 }
 0x1bf   :  { %v175_v16 = vmul.f32 0.6931472, %v264_v13 }
 0x1c1   :  { %v176_v21 = vadd.f32 %v175_v16, %v339_v17 }
 0x1fa   :  { %v125_v18 = vpop.xlane.xlu1 %124 }
 0x1fb   :  { %v126_v19 = vsub.f32 %v107_v15, %v125_v18 }
 0x1fd   :  { %v127_v20 = vrot.slane %v126_v19, 4 }
 0x1ff   :  { %v128_v22 = vadd.f32 %v127_v20, %v126_v19  ;;  %v194_v23 = vpop.xlane.xlu1 %193 }
 0x200   :  { %v195_v24 = vsub.f32 %v176_v21, %v194_v23 }
 0x201   :  { %v129_v6 = vrot.slane %v128_v22, 2 }
 0x202   :  { %v196_v25 = vrot.slane %v195_v24, 4  ;;  %v155_v31 = vpop.permute.xlu0 %154 }
 0x203   :  { %v130_v26 = vadd.f32 %v129_v6, %v128_v22  ;;  %v157_v35 = vsel %vm151_vm12, %v155_v31, 0.0 }
 0x204   :  { %v197_v27 = vadd.f32 %v196_v25, %v195_v24 }
 0x205   :  { %v131_v28 = vrot.slane %v130_v26, 1 }
 0x206   :  { %v198_v29 = vrot.slane %v197_v27, 2 }
 0x207   :  { %v132_v14 = vadd.f32 %v131_v28, %v130_v26 }
 0x208   :  { %v199_v30 = vadd.f32 %v198_v29, %v197_v27 }
 0x209   :  { %v134_v17 = vsel %vm133_vm11, %v132_v14, 0.0 }
 0x20a   :  { %v200_v33 = vrot.slane %v199_v30, 1  ;;  %v135_v34 = vadd.f32 %v134_v17, %v88_v32 }
 0x20c   :  { %v158_v36 = vadd.f32 %v157_v35, %v135_v34  ;;  %v201_v37 = vadd.f32 %v200_v33, %v199_v30 }
 0x20e   :  { %v203_v38 = vsel %vm202_vm13, %v201_v37, 0.0 }
 0x20f   :  { %v204_v40 = vadd.f32 %v203_v38, %v158_v36 }
 0x211   :  { %v206_v41 = vadd.f32 %v205_v39, %v204_v40 }
 0x213   :  { %208 = vst.msk [vmem:[#allocation2] sm:$0x1] %vm50_vm2, %v206_v41 }
 0x214   :  { %276 = shalt.err (!%p273_p4)
}
 0x215   :  { %s277_s22 = scalar_lea.hbm %s376_s2, 16 }
 0x216   :  { %p278_p5 = scmp.ne.s32.totalorder %s376_s2, %s277_s22  ;;  %p281_p6 = scmp.lt.u32.totalorder %s277_s22, %s376_s2 }
 0x218   :  { %p283_p7 = pnand %p281_p6, %p278_p5 }
 0x21a   :  { %286 = shalt.err (!%p283_p7)
}
 0x21b   :  { %218 = dma.vmem_to_hbm [thread:$0]  %s216_s17, 16, %s376_s2, [#allocation3]  }
 0x21c   :  { %287 = dma.done.wait [#allocation3], 16  }
 0x21d   :  { %288 = vsyncadd [#allocation3], 4294967280 }
 0x21e   :  { %222 = vsyncpa [#allocation3], 1 }

</bundles_post_ra>
